<compile_context>
chip_gen: v7x
topology: tpu7x:2x2x1
jax: 0.10.0
libtpu: 0.0.40
codegen_flags: <defaults>
</compile_context>

<pallas_src>
from functools import lru_cache, partial

import numpy as np
import jax
import jax.numpy as jnp
from jax.experimental import pallas as pl
from jax.experimental.pallas import tpu as pltpu

from scipy.optimize import linear_sum_assignment  # host-side Hungarian

COST_IS_CLUSTER = 1.0
COST_COREF = 1.0


def _round_up(x, m):
    return ((x + m - 1) // m) * m


def _vmem_limit_bytes():
    """Generation-aware scoped-VMEM limit (v5e/v6e: 128 MiB parts, v7x: 64 MiB)."""
    try:
        cap = int(pltpu.get_tpu_info().vmem_capacity_bytes)
    except Exception:
        cap = None
    if cap is None:
        return 32 * 1024 * 1024                     # safe everywhere (incl. v7x)
    if cap >= 128 * 1024 * 1024:
        return 64 * 1024 * 1024                     # v5e/v6e: bigger tiles, longer DMA bursts
    return min(cap // 2, 32 * 1024 * 1024)          # v7x (64 MiB physical VMEM)


def _choose_l_tiling(max_lt, rtile, qpad, ltile_cap, vmem_limit):
    """Pick (ltile, lpad) from a real budget of ALL VMEM-resident buffers."""
    # double-buffered output block (f32) + tiny per-batch operands + margin
    fixed = 2 * rtile * qpad * 4 + 2 * (rtile * 4 + qpad * 4 + 4) + (2 << 20)
    # per L-element, double-buffered: logits (bf16) + Y^T (bf16) + token mask (f32)
    per_l = 2 * (rtile * 2 + qpad * 2 + 4)
    lt_budget = max(128, ((vmem_limit - fixed) // per_l) // 128 * 128)
    cap = max(128, min(int(ltile_cap), int(lt_budget)))
    lmax = _round_up(max_lt, 128)
    if lmax <= cap:
        return lmax, lmax
    return cap, _round_up(max_lt, cap)


def _total_cost_kernel(lg_ref, yt_ref, tokm_ref, c_ref, colm_ref, invlen_ref,
                       out_ref, *, w_cluster, w_coref):
    """One grid step = (batch b, query-row tile r, L tile l).

    lg_ref     : [1, rtile, ltile] bf16 per-token coref *logits* (pad = 0)
    yt_ref     : [1, ltile, qpad]  bf16 pre-transposed gold targets (0/1, pad = 0)
    tokm_ref   : [1, 1, ltile]     f32  token-valid mask (1 for t < Lt)
    c_ref      : [1, rtile, 1]     f32  "is a cluster" probabilities (pad = 0.5)
    colm_ref   : [1, 1, qpad]      f32  1.0 for real gold columns (j < ngold)
    invlen_ref : [1, 1, 1]         f32  1 / Lt (true, un-padded token count)
    out_ref    : [1, rtile, qpad]  f32  total matching cost (also the L accumulator)
    """
    l_idx = pl.program_id(2)

    @pl.when(l_idx == 0)
    def _init():
        out_ref[...] = jnp.zeros_like(out_ref)

    lg = lg_ref[0]                                 # [rtile, ltile] bf16
    lg32 = lg.astype(jnp.float32)
    tok = tokm_ref[0]                              # [1, ltile]

    # torch F.binary_cross_entropy clamps each log term at -100:
    #   log(1-P)            == -min(softplus(logit), 100)
    #   logP - log(1-P)     == the shipped (clamp-consistent) logit.
    # Padded tokens ship logit 0 -> exact-zero contribution on the MXU path,
    # so only the row-sum term needs the token mask.
    softplus = jnp.maximum(lg32, 0.0) + jnp.log(1.0 + jnp.exp(-jnp.abs(lg32)))
    log1mP = -jnp.minimum(softplus, 100.0)

    # sum_t [ Y*logP + (1-Y)*log1mP ] = logit @ Y^T + rowsum(log1mP)
    # -> one native-bf16 MXU matmul per L tile; the row-sum rides VPU/XLU slots.
    out_ref[0] += (
        jnp.dot(lg, yt_ref[0], preferred_element_type=jnp.float32)
        + jnp.sum(log1mP * tok, axis=-1, keepdims=True)
    )

    # Finalize only on the last L tile: cost_is_cluster is token-independent.
    @pl.when(l_idx == pl.num_programs(2) - 1)
    def _finalize():
        c = c_ref[0]                                         # [rtile, 1]
        logc = jnp.maximum(jnp.log(c), -100.0)
        log1mc = jnp.maximum(jnp.log(1.0 - c), -100.0)
        cm = colm_ref[0]                                     # [1, qpad]
        cost_is_cluster = -(log1mc + cm * (logc - log1mc))   # [rtile, qpad]
        cost_coref = -out_ref[0] * invlen_ref[0]             # mean over true Lt
        out_ref[0] = w_cluster * cost_is_cluster + w_coref * cost_coref


@lru_cache(maxsize=64)
def _build_total_cost_fn(bv, n_rt, rtile, qpad, lpad, ltile,
                         w_cluster, w_coref, vmem_limit):
    """Compile cache keyed on padded/bucketed shapes, cost weights, VMEM limit."""
    kernel = partial(_total_cost_kernel, w_cluster=w_cluster, w_coref=w_coref)
    fn = pl.pallas_call(
        kernel,
        out_shape=jax.ShapeDtypeStruct((bv, n_rt * rtile, qpad), jnp.float32),
        grid_spec=pltpu.PrefetchScalarGridSpec(
            num_scalar_prefetch=0,
            grid=(bv, n_rt, lpad // ltile),          # (batch, Q-row tile, L reduction)
            in_specs=[
                pl.BlockSpec((1, rtile, ltile), lambda b, r, l: (b, r, l)),  # logits (bf16)
                pl.BlockSpec((1, ltile, qpad),  lambda b, r, l: (b, l, 0)),  # Y^T (bf16)
                pl.BlockSpec((1, 1, ltile),     lambda b, r, l: (b, 0, l)),  # token mask
                pl.BlockSpec((1, rtile, 1),     lambda b, r, l: (b, r, 0)),  # cluster prob
                pl.BlockSpec((1, 1, qpad),      lambda b, r, l: (b, 0, 0)),  # column mask
                pl.BlockSpec((1, 1, 1),         lambda b, r, l: (b, 0, 0)),  # 1/Lt
            ],
            out_specs=pl.BlockSpec((1, rtile, qpad), lambda b, r, l: (b, r, 0)),
        ),
        compiler_params=pltpu.CompilerParams(
            # batch & row-tile axes parallel (2 TCs on v7x), L reduction arbitrary.
            dimension_semantics=("parallel", "parallel", "arbitrary"),
            vmem_limit_bytes=int(vmem_limit),
        ),
    )
    return jax.jit(fn)


class HungarianMatcherPallas:
    """Mirrors HungarianMatcher.forward for the documented args configuration."""

    def __init__(self, cost_is_cluster=1.0, cost_coref=1.0,
                 ltile_cap=4096, q_row_split=None):
        assert ltile_cap % 128 == 0
        self.cost_is_cluster = float(cost_is_cluster)
        self.cost_coref = float(cost_coref)
        self.ltile_cap = int(ltile_cap)
        self.q_row_split = q_row_split            # None = auto; 2 keeps both v7x TCs busy

    def compute_cost_matrices(self, outputs, targets):
        """Single batched pallas_call for all valid batch elements.

        Returns (valid_ids, [ [Q, Q] numpy cost matrix per valid element ]).
        """
        clusters = targets['clusters']
        coref_probs = np.asarray(outputs['coref_logits'], dtype=np.float32)     # [B,Q,L]
        cluster_probs = np.asarray(outputs['cluster_logits'], dtype=np.float32)  # [B,Q,1]
        B, Q, _ = coref_probs.shape

        per_elem = []
        for i in range(B):
            tc = np.asarray(clusters[i], dtype=np.float32)
            if tc.shape[1] == 0 or tc.sum() == 0:
                per_elem.append(None)
                continue
            real = tc[tc.sum(-1) > 0]                       # [ngold, Lt]
            per_elem.append((real, int(real.shape[0]), int(real.shape[1])))

        valid_ids = [i for i, e in enumerate(per_elem) if e is not None]
        if not valid_ids:
            return [], []

        bv = len(valid_ids)
        n_rt = self.q_row_split
        if n_rt is None:
            # Heuristic: give the second v7x TensorCore work when the batch axis
            # alone can't (>=16 rows per tile for bf16 sublane packing).
            n_rt = 2 if (bv == 1 and Q >= 32) else 1
        qrow = _round_up(Q, 16 * n_rt)                      # sublane-only row padding
        rtile = qrow // n_rt
        qpad = _round_up(Q, 128)                            # lane-dense Y^T / output cols

        max_lt = max(per_elem[i][2] for i in valid_ids)
        vmem_limit = _vmem_limit_bytes()
        ltile, lpad = _choose_l_tiling(max_lt, rtile, qpad, self.ltile_cap, vmem_limit)

        # One padded batch -> one dispatch, one H2D set, one D2H sync; the
        # 16/128/LTILE bucketing keeps the compile cache small across documents.
        LG = np.zeros((bv, qrow, lpad), np.float32)         # logits, pad 0 (== P=0.5)
        Yt = np.zeros((bv, lpad, qpad), np.float32)         # pre-transposed 0/1 targets
        tokm = np.zeros((bv, 1, lpad), np.float32)
        C = np.full((bv, qrow, 1), 0.5, np.float32)
        colm = np.zeros((bv, 1, qpad), np.float32)
        invl = np.ones((bv, 1, 1), np.float32)

        with np.errstate(divide="ignore"):
            for k, i in enumerate(valid_ids):
                real, ngold, lt = per_elem[i]
                # torch.index_select(coref_logits, 1, arange(Lt))
                P = coref_probs[i][:, :lt]
                lp = np.maximum(np.log(P), -100.0)
                l1p = np.maximum(np.log1p(-P), -100.0)
                LG[k, :Q, :lt] = lp - l1p                   # clamp-consistent logit(P)
                Yt[k, :lt, :ngold] = real.T                 # zero cols = junk clusters
                tokm[k, 0, :lt] = 1.0
                C[k, :Q, :] = cluster_probs[i]
                colm[k, 0, :ngold] = 1.0
                invl[k, 0, 0] = 1.0 / float(lt)

        fn = _build_total_cost_fn(bv, n_rt, rtile, qpad, lpad, ltile,
                                  self.cost_is_cluster, self.cost_coref, vmem_limit)
        costs = fn(jnp.asarray(LG.astype(jnp.bfloat16)),    # host cast: 2 B/elem on PCIe
                   jnp.asarray(Yt.astype(jnp.bfloat16)),    # 0/1: exact in bf16
                   jnp.asarray(tokm),
                   jnp.asarray(C),
                   jnp.asarray(colm),
                   jnp.asarray(invl))
        costs = np.asarray(jax.block_until_ready(costs))    # single D2H transfer
        return valid_ids, [costs[k, :Q, :Q] for k in range(bv)]

    def __call__(self, outputs, targets):
        B = np.asarray(outputs['coref_logits']).shape[0]
        matched_pred = [False] * B
        matched_gold = [False] * B
        valid_ids, cost_mats = self.compute_cost_matrices(outputs, targets)
        # TODO(synk): Hungarian assignment (linear_sum_assignment) is an
        # inherently sequential host algorithm; kept on host, matching the
        # reference's `total_cost.cpu()` step.
        for i, tc in zip(valid_ids, cost_mats):
            ind1, ind2 = linear_sum_assignment(tc)
            matched_pred[i] = np.asarray(ind1, dtype=np.int64)
            matched_gold[i] = np.asarray(ind2, dtype=np.int64)
        return matched_pred, matched_gold


def _reference_total_cost(coref_probs_i, cluster_probs_i, real_clusters,
                          w_cluster=COST_IS_CLUSTER, w_coref=COST_COREF):
    """Pure-numpy (float64) reference of the matcher cost matrix."""
    Q = coref_probs_i.shape[0]
    ngold, lt = real_clusters.shape
    P = np.asarray(coref_probs_i[:, :lt], dtype=np.float64)
    logP = np.maximum(np.log(P), -100.0)
    log1mP = np.maximum(np.log1p(-P), -100.0)
    Y = np.zeros((Q, lt), dtype=np.float64)
    Y[:ngold] = real_clusters
    cost_coref = -(logP @ Y.T + log1mP @ (1.0 - Y).T) / lt
    c = np.asarray(cluster_probs_i, dtype=np.float64)       # [Q, 1]
    logc = np.maximum(np.log(c), -100.0)
    log1mc = np.maximum(np.log1p(-c), -100.0)
    m = np.zeros((1, Q))
    m[0, :ngold] = 1.0
    cost_is_cluster = -(m * logc + (1.0 - m) * log1mc)
    return w_cluster * cost_is_cluster + w_coref * cost_coref


if __name__ == "__main__":
    key = jax.random.PRNGKey(0)
    ka1, ka2, ka3, kb1, kb2, kb3 = jax.random.split(key, 6)

    # ---------------- Test A: batched path, tiled L reduction -----------------
    B, Q, L, R = 2, 16, 200, 6
    coref_probs = jax.nn.sigmoid(jax.random.normal(ka1, (B, Q, L), jnp.float32))
    cluster_probs = jax.nn.sigmoid(jax.random.normal(ka2, (B, Q, 1), jnp.float32))
    clusters_np = np.asarray(
        jax.random.bernoulli(ka3, 0.15, (B, R, L)), dtype=np.float32)
    clusters_np[0, 4:] = 0.0   # batch 0: 4 real gold clusters
    clusters_np[1, 3:] = 0.0   # batch 1: 3 real gold clusters

    outputs = {'coref_logits': np.asarray(coref_probs),
               'cluster_logits': np.asarray(cluster_probs)}
    targets = {'clusters': [clusters_np[i] for i in range(B)], 'mentions': None}

    # ltile_cap=128 exercises the tiled L reduction (L=200 -> Lpad=256, 2 tiles).
    matcher = HungarianMatcherPallas(COST_IS_CLUSTER, COST_COREF, ltile_cap=128)
    valid_ids, cost_mats = matcher.compute_cost_matrices(outputs, targets)
    assert valid_ids == [0, 1]
    for i, got in zip(valid_ids, cost_mats):
        tc = clusters_np[i]
        real = tc[tc.sum(-1) > 0]
        want = _reference_total_cost(outputs['coref_logits'][i],
                                     outputs['cluster_logits'][i], real)
        assert got.shape == (Q, Q)
        # bf16 logits on the MXU -> ~0.4% relative noise on the coref term.
        assert np.allclose(got, want, rtol=5e-2, atol=5e-2), \
            f"cost matrix mismatch (max abs err {np.abs(got - want).max()})"

    matched_pred, matched_gold = matcher(outputs, targets)
    for p, g in zip(matched_pred, matched_gold):
        assert p is not False and g is not False
        assert len(p) == len(g) == Q

    # ------- Test B: single document, explicit query-row split (2 tiles) ------
    Qb, Lb, Rb = 32, 300, 10
    coref_b = jax.nn.sigmoid(jax.random.normal(kb1, (1, Qb, Lb), jnp.float32))
    clust_b = jax.nn.sigmoid(jax.random.normal(kb2, (1, Qb, 1), jnp.float32))
    clusters_b = np.asarray(jax.random.bernoulli(kb3, 0.2, (1, Rb, Lb)), np.float32)
    clusters_b[0, 7:] = 0.0    # 7 real gold clusters
    outputs_b = {'coref_logits': np.asarray(coref_b),
                 'cluster_logits': np.asarray(clust_b)}
    targets_b = {'clusters': [clusters_b[0]], 'mentions': None}
    matcher_b = HungarianMatcherPallas(ltile_cap=128, q_row_split=2)
    vids_b, mats_b = matcher_b.compute_cost_matrices(outputs_b, targets_b)
    assert vids_b == [0]
    real_b = clusters_b[0][clusters_b[0].sum(-1) > 0]
    want_b = _reference_total_cost(outputs_b['coref_logits'][0],
                                   outputs_b['cluster_logits'][0], real_b)
    assert mats_b[0].shape == (Qb, Qb)
    assert np.allclose(mats_b[0], want_b, rtol=5e-2, atol=5e-2), \
        f"row-split cost mismatch (max abs err {np.abs(mats_b[0] - want_b).max()})"

    # ------------- Test C: empty-gold element returns False paths -------------
    targets_c = {'clusters': [clusters_np[0], np.zeros_like(clusters_np[1])],
                 'mentions': None}
    mp_c, mg_c = matcher(outputs, targets_c)
    assert mp_c[1] is False and mg_c[1] is False
    assert mp_c[0] is not False and len(mp_c[0]) == Q

    print("KERNEL_OK")
</pallas_src>

<mosaic_0001>
module attributes {stable_mosaic.version = 11 : i64} {
  func.func @_total_cost_kernel(%arg0: i32, %arg1: i32, %arg2: i32, %arg3: memref<1x16x128xbf16, #tpu.memory_space<vmem>>, %arg4: memref<1x128x128xbf16, #tpu.memory_space<vmem>>, %arg5: memref<1x1x128xf32, #tpu.memory_space<vmem>>, %arg6: memref<1x16x1xf32, #tpu.memory_space<vmem>>, %arg7: memref<1x1x128xf32, #tpu.memory_space<vmem>>, %arg8: memref<1x1x1xf32, #tpu.memory_space<vmem>>, %arg9: memref<1x16x128xf32, #tpu.memory_space<vmem>>) attributes {dimension_semantics = [#tpu.dimension_semantics<parallel>, #tpu.dimension_semantics<parallel>, #tpu.dimension_semantics<arbitrary>], iteration_bounds = array<i64: 2, 1, 2>, scalar_prefetch = 0 : i64, scratch_operands = 0 : i64, tpu.core_type = #tpu.core_type<tc>, window_params = [{transform_indices = @transform_0, window_bounds = array<i64: 1, 16, 128>}, {transform_indices = @transform_1, window_bounds = array<i64: 1, 128, 128>}, {transform_indices = @transform_2, window_bounds = array<i64: 1, 1, 128>}, {transform_indices = @transform_3, window_bounds = array<i64: 1, 16, 1>}, {transform_indices = @transform_4, window_bounds = array<i64: 1, 1, 128>}, {transform_indices = @transform_5, window_bounds = array<i64: 1, 1, 1>}, {transform_indices = @transform_6, window_bounds = array<i64: 1, 16, 128>}]} {
    %c0_i32 = arith.constant 0 : i32
    %0 = arith.cmpi eq, %arg2, %c0_i32 : i32
    %1 = arith.extui %0 : i1 to i32
    %c0_i32_0 = arith.constant 0 : i32
    %2 = arith.cmpi ne, %1, %c0_i32_0 : i32
    scf.if %2 {
      %cst_22 = arith.constant 0.000000e+00 : f32
      %40 = vector.broadcast %cst_22 : f32 to vector<1x16x128xf32>
      %c0_23 = arith.constant 0 : index
      %c0_24 = arith.constant 0 : index
      %c0_25 = arith.constant 0 : index
      %41 = vector.load %arg9[%c0_23, %c0_24, %c0_25] : memref<1x16x128xf32, #tpu.memory_space<vmem>>, vector<1x16x128xf32>
      tpu.vector_store %arg9[%c0_23, %c0_24, %c0_25], %40 {strides = array<i32>} : memref<1x16x128xf32, #tpu.memory_space<vmem>>, vector<1x16x128xf32>,
    } else {
    }
    %c0 = arith.constant 0 : index
    %c0_1 = arith.constant 0 : index
    %c0_2 = arith.constant 0 : index
    %3 = vector.load %arg3[%c0, %c0_1, %c0_2] : memref<1x16x128xbf16, #tpu.memory_space<vmem>>, vector<1x16x128xbf16>
    %4 = vector.shape_cast %3 : vector<1x16x128xbf16> to vector<16x128xbf16>
    %5 = arith.extf %4 : vector<16x128xbf16> to vector<16x128xf32>
    %c0_3 = arith.constant 0 : index
    %c0_4 = arith.constant 0 : index
    %c0_5 = arith.constant 0 : index
    %6 = vector.load %arg5[%c0_3, %c0_4, %c0_5] : memref<1x1x128xf32, #tpu.memory_space<vmem>>, vector<1x1x128xf32>
    %7 = vector.shape_cast %6 : vector<1x1x128xf32> to vector<1x128xf32>
    %cst = arith.constant 0.000000e+00 : f32
    %8 = vector.broadcast %cst : f32 to vector<16x128xf32>
    %9 = arith.maximumf %5, %8 : vector<16x128xf32>
    %10 = math.absf %5 : vector<16x128xf32>
    %cst_6 = arith.constant 0.000000e+00 : f32
    %11 = vector.broadcast %cst_6 : f32 to vector<16x128xf32>
    %12 = arith.subf %11, %10 : vector<16x128xf32>
    %13 = math.exp %12 : vector<16x128xf32>
    %cst_7 = arith.constant 1.000000e+00 : f32
    %14 = vector.broadcast %cst_7 : f32 to vector<16x128xf32>
    %15 = arith.addf %14, %13 : vector<16x128xf32>
    %16 = math.log %15 : vector<16x128xf32>
    %17 = arith.addf %9, %16 : vector<16x128xf32>
    %cst_8 = arith.constant 1.000000e+02 : f32
    %18 = vector.broadcast %cst_8 : f32 to vector<16x128xf32>
    %19 = arith.minimumf %17, %18 : vector<16x128xf32>
    %cst_9 = arith.constant 0.000000e+00 : f32
    %20 = vector.broadcast %cst_9 : f32 to vector<16x128xf32>
    %21 = arith.subf %20, %19 : vector<16x128xf32>
    %c0_10 = arith.constant 0 : index
    %c0_11 = arith.constant 0 : index
    %c0_12 = arith.constant 0 : index
    %22 = vector.load %arg9[%c0_10, %c0_11, %c0_12] : memref<1x16x128xf32, #tpu.memory_space<vmem>>, vector<1x16x128xf32>
    %23 = vector.shape_cast %22 : vector<1x16x128xf32> to vector<16x128xf32>
    %c0_13 = arith.constant 0 : index
    %c0_14 = arith.constant 0 : index
    %c0_15 = arith.constant 0 : index
    %24 = vector.load %arg4[%c0_13, %c0_14, %c0_15] : memref<1x128x128xbf16, #tpu.memory_space<vmem>>, vector<1x128x128xbf16>
    %25 = vector.shape_cast %24 : vector<1x128x128xbf16> to vector<128x128xbf16>
    %cst_16 = arith.constant dense<0.000000e+00> : vector<16x128xf32>
    %26 = tpu.matmul %4, %25, %cst_16 {dimension_numbers = #tpu.dot_dimension_numbers<[1], [0], [0], [1], [0, 0, 1, 1], [], []>} : vector<16x128xbf16>, vector<128x128xbf16>, vector<16x128xf32> -> vector<16x128xf32>
    %27 = vector.broadcast %7 : vector<1x128xf32> to vector<16x128xf32>
    %28 = arith.mulf %21, %27 : vector<16x128xf32>
    %cst_17 = arith.constant dense<0.000000e+00> : vector<16xf32>
    %29 = vector.multi_reduction <add>, %28, %cst_17 [1] : vector<16x128xf32> to vector<16xf32>
    %30 = vector.shape_cast %29 : vector<16xf32> to vector<16x1xf32>
    %31 = vector.broadcast %30 : vector<16x1xf32> to vector<16x128xf32>
    %32 = arith.addf %26, %31 : vector<16x128xf32>
    %33 = arith.addf %23, %32 : vector<16x128xf32>
    %c0_18 = arith.constant 0 : index
    %c0_19 = arith.constant 0 : index
    %c0_20 = arith.constant 0 : index
    %34 = vector.load %arg9[%c0_18, %c0_19, %c0_20] : memref<1x16x128xf32, #tpu.memory_space<vmem>>, vector<1x16x128xf32>
    %35 = vector.shape_cast %34 : vector<1x16x128xf32> to vector<16x128xf32>
    %36 = vector.shape_cast %33 : vector<16x128xf32> to vector<1x16x128xf32>
    tpu.vector_store %arg9[%c0_18, %c0_19, %c0_20], %36 {strides = array<i32>} : memref<1x16x128xf32, #tpu.memory_space<vmem>>, vector<1x16x128xf32>,
    %c1_i32 = arith.constant 1 : i32
    %37 = arith.cmpi eq, %arg2, %c1_i32 : i32
    %38 = arith.extui %37 : i1 to i32
    %c0_i32_21 = arith.constant 0 : i32
    %39 = arith.cmpi ne, %38, %c0_i32_21 : i32
    scf.if %39 {
      %c0_22 = arith.constant 0 : index
      %c0_23 = arith.constant 0 : index
      %c0_24 = arith.constant 0 : index
      %40 = vector.load %arg6[%c0_22, %c0_23, %c0_24] : memref<1x16x1xf32, #tpu.memory_space<vmem>>, vector<1x16x1xf32>
      %41 = vector.shape_cast %40 : vector<1x16x1xf32> to vector<16x1xf32>
      %42 = math.log %41 : vector<16x1xf32>
      %cst_25 = arith.constant -1.000000e+02 : f32
      %43 = vector.broadcast %cst_25 : f32 to vector<16x1xf32>
      %44 = arith.maximumf %42, %43 : vector<16x1xf32>
      %cst_26 = arith.constant 1.000000e+00 : f32
      %45 = vector.broadcast %cst_26 : f32 to vector<16x1xf32>
      %46 = arith.subf %45, %41 : vector<16x1xf32>
      %47 = math.log %46 : vector<16x1xf32>
      %cst_27 = arith.constant -1.000000e+02 : f32
      %48 = vector.broadcast %cst_27 : f32 to vector<16x1xf32>
      %49 = arith.maximumf %47, %48 : vector<16x1xf32>
      %c0_28 = arith.constant 0 : index
      %c0_29 = arith.constant 0 : index
      %c0_30 = arith.constant 0 : index
      %50 = vector.load %arg7[%c0_28, %c0_29, %c0_30] : memref<1x1x128xf32, #tpu.memory_space<vmem>>, vector<1x1x128xf32>
      %51 = vector.shape_cast %50 : vector<1x1x128xf32> to vector<1x128xf32>
      %52 = arith.subf %44, %49 : vector<16x1xf32>
      %53 = vector.broadcast %51 : vector<1x128xf32> to vector<16x128xf32>
      %54 = vector.broadcast %52 : vector<16x1xf32> to vector<16x128xf32>
      %55 = arith.mulf %53, %54 : vector<16x128xf32>
      %56 = vector.broadcast %49 : vector<16x1xf32> to vector<16x128xf32>
      %57 = arith.addf %56, %55 : vector<16x128xf32>
      %cst_31 = arith.constant 0.000000e+00 : f32
      %58 = vector.broadcast %cst_31 : f32 to vector<16x128xf32>
      %59 = arith.subf %58, %57 : vector<16x128xf32>
      %c0_32 = arith.constant 0 : index
      %c0_33 = arith.constant 0 : index
      %c0_34 = arith.constant 0 : index
      %60 = vector.load %arg9[%c0_32, %c0_33, %c0_34] : memref<1x16x128xf32, #tpu.memory_space<vmem>>, vector<1x16x128xf32>
      %61 = vector.shape_cast %60 : vector<1x16x128xf32> to vector<16x128xf32>
      %cst_35 = arith.constant 0.000000e+00 : f32
      %62 = vector.broadcast %cst_35 : f32 to vector<16x128xf32>
      %63 = arith.subf %62, %61 : vector<16x128xf32>
      %c0_36 = arith.constant 0 : index
      %c0_37 = arith.constant 0 : index
      %c0_38 = arith.constant 0 : index
      %64 = vector.load %arg8[%c0_36, %c0_37, %c0_38] : memref<1x1x1xf32, #tpu.memory_space<vmem>>, vector<1x1x1xf32>
      %65 = vector.shape_cast %64 : vector<1x1x1xf32> to vector<1x1xf32>
      %66 = vector.broadcast %65 : vector<1x1xf32> to vector<16x128xf32>
      %67 = arith.mulf %63, %66 : vector<16x128xf32>
      %cst_39 = arith.constant 1.000000e+00 : f32
      %68 = vector.broadcast %cst_39 : f32 to vector<16x128xf32>
      %69 = arith.mulf %68, %59 : vector<16x128xf32>
      %cst_40 = arith.constant 1.000000e+00 : f32
      %70 = vector.broadcast %cst_40 : f32 to vector<16x128xf32>
      %71 = arith.mulf %70, %67 : vector<16x128xf32>
      %72 = arith.addf %69, %71 : vector<16x128xf32>
      %c0_41 = arith.constant 0 : index
      %c0_42 = arith.constant 0 : index
      %c0_43 = arith.constant 0 : index
      %73 = vector.load %arg9[%c0_41, %c0_42, %c0_43] : memref<1x16x128xf32, #tpu.memory_space<vmem>>, vector<1x16x128xf32>
      %74 = vector.shape_cast %73 : vector<1x16x128xf32> to vector<16x128xf32>
      %75 = vector.shape_cast %72 : vector<16x128xf32> to vector<1x16x128xf32>
      tpu.vector_store %arg9[%c0_41, %c0_42, %c0_43], %75 {strides = array<i32>} : memref<1x16x128xf32, #tpu.memory_space<vmem>>, vector<1x16x128xf32>,
    } else {
    }
    return
  }
  func.func @transform_0(%arg0: i32, %arg1: i32, %arg2: i32) -> (i32, i32, i32) {
    %c0_i32 = arith.constant 0 : i32
    return %arg0, %arg1, %arg2 : i32, i32, i32
  }
  func.func @transform_1(%arg0: i32, %arg1: i32, %arg2: i32) -> (i32, i32, i32) {
    %c0_i32 = arith.constant 0 : i32
    %c0_i32_0 = arith.constant 0 : i32
    return %arg0, %arg2, %c0_i32 : i32, i32, i32
  }
  func.func @transform_2(%arg0: i32, %arg1: i32, %arg2: i32) -> (i32, i32, i32) {
    %c0_i32 = arith.constant 0 : i32
    %c0_i32_0 = arith.constant 0 : i32
    return %arg0, %c0_i32, %arg2 : i32, i32, i32
  }
  func.func @transform_3(%arg0: i32, %arg1: i32, %arg2: i32) -> (i32, i32, i32) {
    %c0_i32 = arith.constant 0 : i32
    %c0_i32_0 = arith.constant 0 : i32
    return %arg0, %arg1, %c0_i32 : i32, i32, i32
  }
  func.func @transform_4(%arg0: i32, %arg1: i32, %arg2: i32) -> (i32, i32, i32) {
    %c0_i32 = arith.constant 0 : i32
    %c0_i32_0 = arith.constant 0 : i32
    %c0_i32_1 = arith.constant 0 : i32
    return %arg0, %c0_i32, %c0_i32_0 : i32, i32, i32
  }
  func.func @transform_5(%arg0: i32, %arg1: i32, %arg2: i32) -> (i32, i32, i32) {
    %c0_i32 = arith.constant 0 : i32
    %c0_i32_0 = arith.constant 0 : i32
    %c0_i32_1 = arith.constant 0 : i32
    return %arg0, %c0_i32, %c0_i32_0 : i32, i32, i32
  }
  func.func @transform_6(%arg0: i32, %arg1: i32, %arg2: i32) -> (i32, i32, i32) {
    %c0_i32 = arith.constant 0 : i32
    %c0_i32_0 = arith.constant 0 : i32
    return %arg0, %arg1, %c0_i32 : i32, i32, i32
  }
}

</mosaic_0001>

<bundles_post_ra>
// kernel: tpu_custom_call.1
= control target key start
LH: loop header
LB: loop body
LE: loop exit
PB: predicated region body
PF: predicated region fallthrough
CT: control target
= control target key end

     0   :  { %s1576_s0 = inlined_call_operand.vmem [shape: bf16[2,16,256], index: 0, kind: input, shape index: {}]   ;;  %s1577_s1 = inlined_call_operand.hbm [shape: bf16[2,256,128], index: 1, kind: input, shape index: {}]   ;;  %s1578_s2 = inlined_call_operand.vmem [shape: f32[2,1,256], index: 2, kind: input, shape index: {}]   ;;  %s1579_s3 = inlined_call_operand.vmem [shape: f32[2,16,1], index: 3, kind: input, shape index: {}]   ;;  %s1580_s4 = inlined_call_operand.vmem [shape: f32[2,1,128], index: 4, kind: input, shape index: {}]   ;;  %s1581_s5 = inlined_call_operand.vmem [shape: f32[2,1,1], index: 5, kind: input, shape index: {}]   ;;  %s1582_s6 = inlined_call_operand.hbm [shape: f32[2,16,128], index: 6, kind: output, shape index: {}]  }
   0x1   :  { %1593 = sst [smem:[#allocation18_spill]] %s1576_s0 }
   0x2   :  { %1594 = sst [smem:[#allocation19_spill]] %s1577_s1 }
   0x3   :  { %1595 = sst [smem:[#allocation20_spill]] %s1582_s6 }
   0x4   :  { %11 = vsyncpa [#allocation4], 0 }
   0x5   :  { %13 = vsyncpa [#allocation4 + $0x1], 0 }
   0x6   :  { %14 = vsyncpa [#allocation5], 0 }
   0x7   :  { %16 = vsyncpa [#allocation5 + $0x1], 0  ;;  %s1282_s21 = smov 0   ;;  %s1284_s22 = smov 0  }
   0x8   :  { %s1286_s23 = smov 0   ;;  %s1288_s24 = smov 0  }
   0x9   :  { %s1290_s25 = smov 0   ;;  %s1292_s26 = smov 0  }
   0xa   :  { %s1294_s27 = smov 0   ;;  %s1296_s28 = smov 0  }
   0xb   :  { %s1298_s29 = smov 0   ;;  %s1300_s30 = smov 0  }
   0xc   :  { %s1302_s7 = smov 0  }
   0xd LB: > { %1596 = sst [smem:[#allocation9_spill]] %s1195_s21  ;;  %s884_s8 = sadd.s32 4294967295, %s1235_s7   ;;  %s1235_s7 = sphi %s1302_s7, %s22_s7   ;;  %s1231_s30 = sphi %s1300_s30, %s1623_s30   ;;  %s1227_s29 = sphi %s1298_s29, %s1622_s29   ;;  %s1223_s28 = sphi %s1296_s28, %s1621_s28   ;;  %s1219_s27 = sphi %s1294_s27, %s1620_s27   ;;  %s1215_s26 = sphi %s1292_s26, %s1628_s26   ;;  %s1211_s25 = sphi %s1290_s25, %s1627_s25   ;;  %s1207_s24 = sphi %s1288_s24, %s1626_s24   ;;  %s1203_s23 = sphi %s1286_s23, %s1618_s23   ;;  %s1199_s22 = sphi %s1284_s22, %s1625_s22   ;;  %s1195_s21 = sphi %s1282_s21, %s1624_s21  }
   0xe   : > { %1597 = sst [smem:[#allocation10_spill]] %s1203_s23  ;;  %s885_s9 = sadd.s32 4294967294, %s1235_s7  }
   0xf   : > { %1598 = sst [smem:[#allocation11_spill]] %s1227_s29  ;;  %s34_s10 = sadd.s32 1, %s1227_s29 }
  0x10   : > { %1599 = sst [smem:[#allocation12_spill]] %s1231_s30  ;;  %s41_s11 = sadd.s32 1, %s1231_s30 }
  0x11   : > { %p35_p0 = scmp.ge.s32.totalorder %s34_s10, 2  ;;  %s52_s12 = sadd.s32 1, %s1215_s26 }
  0x12   : > { %p59_p1 = scmp.ne.s32.totalorder %s1215_s26, %s1211_s25  ;;  %p60_p2 = scmp.eq.s32.totalorder %s1235_s7, 0 }
  0x13   : > { %s1630_s10 = smov (%p35_p0, %s34_s10), 0  ;;  %s1632_s11 = smov (!%p35_p0, %s41_s11), %s1231_s30 }
  0x14   : > { %1600 = sst [smem:[#allocation13_spill]] %s1630_s10  ;;  %s48_s13 = ssub.s32 %s1227_s29, %s1630_s10 }
  0x15   : > { %p1348_p3 = por %p60_p2, %p59_p1  ;;  %p43_p4 = scmp.ge.s32.totalorder %s1632_s11, 2 }
  0x16   : > { %p93_p5 = scmp.ne.s32.totalorder %s1211_s25, %s1207_s24  ;;  %p94_p6 = scmp.eq.s32.totalorder %s884_s8, 0 }
  0x17   : > { %s216_s15 = sadd.s32 1, %s1203_s23  ;;  %s1634_s11 = smov (%p43_p4, %s1632_s11), 0 }
  0x18   : > { %1602 = sst [smem:[#allocation14_spill]] %s1634_s11  ;;  %p1356_p7 = por %p94_p6, %p93_p5 }
  0x19   : > { %p226_p8 = scmp.ne.s32.totalorder %s1203_s23, %s1199_s22  ;;  %s45_s17 = ssub.s32 %s1231_s30, %s1634_s11 }
  0x1a   : > { %p227_p9 = scmp.eq.s32.totalorder %s884_s8, 3  ;;  %s49_s18 = sor.u32 %s48_s13, %s45_s17 }
  0x1b   : > { %p214_p10 = scmp.eq.s32.totalorder %s45_s17, 0  ;;  %p50_p11 = scmp.eq.s32.totalorder %s49_s18, 0 }
  0x1c   : > { %p1364_p12 = por %p227_p9, %p226_p8  ;;  %p232_p13 = scmp.ne.s32.totalorder %s1199_s22, %s1195_s21 }
  0x1d   : > { %s1369_s20 = scalar_select %p214_p10, %s1203_s23, %s216_s15  }
  0x1e   : > { %s1604_s19 = scalar_select %p1364_p12, 1, 0 }
  0x1f   : > { %1605 = sst [smem:[#allocation15_spill]] %s1369_s20  ;;  %p233_p0 = scmp.eq.s32.totalorder %s885_s9, 3 }
  0x20   : > { %s1372_s24 = scalar_select %p50_p11, %s1215_s26, %s52_s12  }
  0x21   : > { %p1376_p1 = por %p233_p0, %p232_p13  ;;  %p887_p2 = scmp.ge.s32.totalorder %s1235_s7, 4 }
  0x22   : > { %1606 = sst [smem:[#allocation16_spill]] %s1372_s24 }
  0x23   : > { %s1607_s10 = scalar_select %p1376_p1, 1, 0 }
  0x24   : > { %249 = sbr.rel (%p887_p2) target bundleno = 87 (0x57), region = 16 }
  0x25   : > { %1608 = sst [smem:[#allocation17_spill]] %s1607_s10 }
  0x2b   : > { %252 = sbr.rel (!%p1348_p3) target bundleno = 54 (0x36), region = 20  ;;  %s254_s8 = sand.u32 (%p1348_p3), 1, %s1215_s26  }
  0x2c   : > { %s889_s13 = sshll.u32 (%p1348_p3), %s1231_s30, 2  ;;  %s888_s15 = sshll.u32 (%p1348_p3), %s254_s8, 3 }
  0x2d   : > { %s261_s12 = sadd.s32 (%p1348_p3), %s1227_s29, %s889_s13  ;;  %s1609_s0 = sld [smem:[#allocation18_spill]] (%p1348_p3) }
  0x2e   : > { %s890_s17 = sshll.u32 (%p1348_p3), %s261_s12, 2  ;;  %s256_s24 = scalar_lea.vmem (%p1348_p3), [#allocation2], %s888_s15 }
  0x33   : > { %s263_s11 = scalar_lea.vmem %s1609_s0, %s890_s17 }
  0x34   : > { %v279_v0 = vld [vmem:[%s263_s11] sm:$0xf]  ;;  %v281_v1 = vld [vmem:[%s263_s11 + $0x8] sm:$0xf] }
  0x35   : > { %280 = vst [vmem:[%s256_s24] sm:$0xf] %v279_v0  ;;  %282 = vst [vmem:[%s256_s24 + $0x4] sm:$0xf] %v281_v1 }
  0x36 PF: > { %s310_s20 = sand.u32 1, %s1215_s26   ;;  %s892_s23 = sshll.u32 %s1227_s29, 4 }
  0x37   : > { %s891_s10 = sshll.u32 %s310_s20, 6  ;;  %s893_s8 = sshll.u32 %s1231_s30, 5 }
  0x38   : > { %s320_s13 = sadd.s32 %s893_s8, %s892_s23  ;;  %s314_s12 = scalar_lea.vmem [#allocation3], %s891_s10 }
  0x39   : > { %s323_s21 = sshll.u32 %s314_s12, 4  ;;  %s894_s6 = sshll.u32 %s320_s13, 6  ;;  %s1392_s21 = int_to_ptr.vmem [resolvable:$true] %s323_s21 }
  0x3a   : > { %s1610_s1 = sld [smem:[#allocation19_spill]]  ;;  %s1399_s24 = scalar_lea.sflag [#allocation4], %s310_s20 }
  0x40   : > { %s1397_s15 = scalar_lea.hbm %s1610_s1, %s894_s6  ;;  %s1089_s9 = scalar_lea.hbm %s1610_s1, 4096 }
  0x41   : > { %s1085_s18 = scalar_lea.hbm %s1397_s15, 1024  ;;  %p1090_p8 = scmp.lt.u32.totalorder %s1397_s15, %s1610_s1 }
  0x42   : > { %p1086_p4 = scmp.ne.s32.totalorder %s1397_s15, %s1085_s18  ;;  %p1091_p9 = scmp.lt.u32.totalorder %s1089_s9, %s1085_s18 }
  0x43   : > { %p1093_p11 = scmp.lt.u32.totalorder %s1085_s18, %s1397_s15 }
  0x44   : > { %p1087_p5 = pnand %p1086_p4, %p1348_p3  ;;  %p1092_p10 = por %p1091_p9, %p1090_p8 }
  0x46   : > { %p1088_p6 = pneg %p1087_p5  ;;  %p1094_p13 = por %p1093_p11, %p1092_p10 }
  0x48   : > { %p1095_p0 = pnand %p1094_p13, %p1088_p6 }
  0x4a   : > { %1098 = shalt.err (!%p1095_p0)
}
  0x4b   : > { %s1099_s6 = scalar_lea.vmem %s1392_s21, 1024  ;;  %s1237_s20 = smov [#allocation3]  }
  0x4c   : > { %p1100_p2 = scmp.ne.s32.totalorder %s1392_s21, %s1099_s6  ;;  %s1103_s12 = sshll.u32 %s1237_s20, 4  ;;  %s1104_s12 = int_to_ptr.vmem [resolvable:$false] %s1103_s12 }
  0x4d   : > { %s1105_s17 = scalar_lea.vmem %s1104_s12, 2048  ;;  %p1106_p1 = scmp.lt.s32.totalorder %s1392_s21, %s1104_s12 }
  0x4e   : > { %p1101_p4 = pnand %p1100_p2, %p1348_p3  ;;  %p1107_p12 = scmp.lt.s32.totalorder %s1105_s17, %s1099_s6 }
  0x50   : > { %p1102_p5 = pneg %p1101_p4  ;;  %p1108_p8 = por %p1107_p12, %p1106_p1 }
  0x52   : > { %p1109_p9 = pnand %p1108_p8, %p1102_p5 }
  0x54   : > { %1112 = shalt.err (!%p1109_p9)
}
  0x55   : > { %s1238_s11 = smov 64   ;;  %s1239_s18 = smov 4  }
  0x56   : > { %952 = dma.hbm_to_vmem [thread:$0]  (%p1348_p3), %s1397_s15, 1024, %s1392_s21, %s1399_s24, %s1238_s11, %s1238_s11, %s1239_s18  }
  0x57 PF: > { %p895_p6 = scmp.ge.s32.totalorder %s1235_s7, 1  ;;  %p366_p10 = scmp.lt.s32.totalorder %s1235_s7, 5 }
  0x59   : > { %p367_p11 = pnand %p895_p6, %p366_p10 }
  0x5a   : > { %s373_s23 = sand.u32 (!%p367_p11), 1, %s1211_s25  }
  0x5b   : > { %370 = sbr.rel (%p367_p11) target bundleno = 410 (0x19a), region = 81  ;;  %s896_s10 = sshll.u32 (!%p367_p11), %s373_s23, 3 }
  0x5c   : > { %s897_s9 = sshll.u32 (!%p367_p11), %s373_s23, 6  ;;  %s1426_s8 = scalar_lea.vmem (!%p367_p11), [#allocation2], %s896_s10 }
  0x5d   : > { %s380_s13 = scalar_lea.sflag (!%p367_p11), [#allocation4], %s373_s23  ;;  %s1428_s6 = scalar_lea.vmem (!%p367_p11), [#allocation3], %s897_s9 }
  0x62   : > { %1186 = dma.done.wait (%p1356_p7), %s380_s13, 1024  }
  0x63   : > { %1188 = vsyncadd (%p1356_p7), %s380_s13, 4294966272  ;;  %s1590_s21 = sand.u32 1, %s1199_s22   ;;  %p440_p3 = scmp.lt.s32.totalorder %s1223_s28, 1 }
  0x64   : > { %s898_s14 = sshll.u32 %s1590_s21, 4  ;;  %p442_p12 = scmp.lt.s32.totalorder %s1219_s27, 1 }
  0x65   : > { %s1440_s15 = scalar_select %p440_p3, %s1223_s28, 1 }
  0x66   : > { %s443_s24 = scalar_select %p442_p12, %s1219_s27, 1 }
  0x67   : > { %s899_s16 = sshll.u32 %s1440_s15, 1  ;;  %s921_s20 = sshll.u32 %s1440_s15, 4 }
  0x68   : > { %s1445_s12 = sadd.s32 %s899_s16, %s443_s24  ;;  %s1450_s18 = scalar_lea.vmem %s1579_s3, %s921_s20 }
  0x69   : > { %s446_s9 = scalar_lea.vmem %s1578_s2, %s1445_s12  ;;  %s459_s0 = scalar_lea.vmem %s1580_s4, %s1440_s15 }
  0x6a   : > { %s462_s29 = scalar_lea.vmem %s1581_s5, %s1440_s15  ;;  %s1464_s24 = scalar_lea.vmem [#allocation6], %s898_s14 }
  0x6b   : > { %p902_p7 = scmp.ne.s32.totalorder %s1219_s27, 0 }
  0x6c   : > { %v1240_v2 = vmov (!%p902_p7), 0.0  }
  0x6d   : > { %468 = sbr.rel (%p902_p7) target bundleno = 116 (0x74), region = 93  ;;  %469 = vst [vmem:[%s1464_s24] sm:$0xff] (!%p902_p7), %v1240_v2  ;;  %470 = vst [vmem:[%s1464_s24 + $0x8] sm:$0xff] (!%p902_p7), %v1240_v2 }
  0x74 PF: > { %v1057_v3 = vld [vmem:[%s1428_s6] sm:$0xff]   ;;  %v1241_v4 = vmov 0.0   ;;  %v1058_v5 = vld [vmem:[%s1428_s6 + $0x8] sm:$0xff]   ;;  %vm1242_vm0 = vmmov 0   ;;  %v1059_v6 = vld [vmem:[%s1428_s6 + $0x10] sm:$0xff]   ;;  %p913_p1 = scmp.ne.s32.totalorder %s1219_s27, 1 }
  0x75   : > { %932 = vmatprep.subr.bf16.mxu0 %v1241_v4  ;;  %948 = vmatprep.mubr.msk.bf16.mxu0 %vm1242_vm0, %v1241_v4  ;;  %v471_v7 = vld [vmem:[%s1426_s8] sm:$0xff]   ;;  %v1061_v15 = vld [vmem:[%s1428_s6 + $0x20] sm:$0xff]   ;;  %v1062_v18 = vld [vmem:[%s1428_s6 + $0x28] sm:$0xff]   ;;  %v1243_v54 = vmov (!%p913_p1), 0  }
  0x76   : > { %933 = vmatpush3.bf16.msra.mxu0 %v1057_v3  ;;  %v473_v8 = vunpack.c.l.bf16 %v471_v7  ;;  %v474_v9 = vunpack.c.h.bf16 %v471_v7  ;;  %v1060_v10 = vld [vmem:[%s1428_s6 + $0x18] sm:$0xff]   ;;  %v1063_v19 = vld [vmem:[%s1428_s6 + $0x30] sm:$0xff]   ;;  %1075 = vset.pattern.permute.xlu1 (!%p913_p1), %v1243_v54 }
  0x77   : > { %934 = vmatprep.subr.bf16.mxu0 %v1241_v4  ;;  %v1064_v20 = vld [vmem:[%s1428_s6 + $0x38] sm:$0xff]   ;;  %v903_v34 = vld [vmem:[%s446_s9] ss:$0 sm:$0xff]  ;;  %1076 = vset.pattern.permute.xlu0 (!%p913_p1), %v1243_v54 }
  0x78   : > { %v478_v11 = vand.u32 2147483647, %v473_v8  ;;  %v479_v12 = vand.u32 2147483647, %v474_v9  ;;  %v476_v25 = vmax.f32 %v473_v8, 0.0  ;;  %v477_v27 = vmax.f32 %v474_v9, 0.0 }
  0x79   : > { %v498_v41 = vld [vmem:[%s1464_s24] sm:$0xff]  ;;  %v499_v47 = vld [vmem:[%s1464_s24 + $0x8] sm:$0xff] }
  0x7a   : > { %935 = vmatpush3.bf16.msra.mxu0 %v1058_v5  ;;  %v480_v13 = vsub.f32 0.0, %v478_v11  ;;  %v481_v14 = vsub.f32 0.0, %v479_v12  ;;  %v631_v52 = vld [vmem:[%s1450_s18] sm:$0xff] (!%p913_p1)  ;;  %v632_v53 = vld [vmem:[%s1450_s18 + $0x8] sm:$0xff] (!%p913_p1) }
  0x7b   : > { %936 = vmatprep.subr.bf16.mxu0 %v1241_v4  ;;  %v639_v55 = vsub.f32 (!%p913_p1), 1.0, %v631_v52  ;;  %v640_v56 = vsub.f32 (!%p913_p1), 1.0, %v632_v53  ;;  %v914_v8 = vld [vmem:[%s459_s0] ss:$0 sm:$0xff] (!%p913_p1) }
  0x7c   : > { %v482_v16 = vmul.f32 1.442695, %v480_v13  ;;  %v484_v17 = vmul.f32 1.442695, %v481_v14 }
  0x7e   : > { %937 = vmatpush3.bf16.msra.mxu0 %v1059_v6  ;;  %1067 = vpow2.f32 %v482_v16 }
  0x7f   : > { %938 = vmatprep.subr.bf16.mxu0 %v1241_v4  ;;  %1069 = vpow2.f32 %v484_v17 }
  0x82   : > { %939 = vmatpush3.bf16.msra.mxu0 %v1060_v10 }
  0x83   : > { %940 = vmatprep.subr.bf16.mxu0 %v1241_v4 }
  0x86   : > { %941 = vmatpush3.bf16.msra.mxu0 %v1061_v15 }
  0x87   : > { %942 = vmatprep.subr.bf16.mxu0 %v1241_v4 }
  0x88   : > { %v1068_v21 = vpop.eup %1067 }
  0x89   : > { %v1070_v22 = vpop.eup %1069  ;;  %v486_v23 = vadd.f32 1.0, %v1068_v21 }
  0x8a   : > { %943 = vmatpush3.bf16.msra.mxu0 %v1062_v18  ;;  %v487_v24 = vadd.f32 1.0, %v1070_v22 }
  0x8b   : > { %944 = vmatprep.subr.bf16.mxu0 %v1241_v4  ;;  %1071 = vlog2.f32 %v486_v23 }
  0x8c   : > { %1073 = vlog2.f32 %v487_v24 }
  0x8d   : > { %1077 = vlog2.f32 (!%p913_p1), %v631_v52 }
  0x8e   : > { %945 = vmatpush3.bf16.msra.mxu0 %v1063_v19  ;;  %1079 = vlog2.f32 (!%p913_p1), %v632_v53 }
  0x8f   : > { %946 = vmatprep.subr.bf16.mxu0 %v1241_v4  ;;  %1081 = vlog2.f32 (!%p913_p1), %v639_v55 }
  0x90   : > { %1083 = vlog2.f32 (!%p913_p1), %v640_v56 }
  0x92   : > { %947 = vmatpush3.bf16.msra.mxu0 %v1064_v20 }
  0x95   : > { %949 = vmatmul.mubr.bf16.vlgmr.msra.gmra.mrb[0].mxu0 %v471_v7  ;;  %v1072_v26 = vpop.eup %1071  ;;  %v915_v7 = vld [vmem:[%s462_s29] ss:$0 sm:$0xff] (!%p913_p1) }
  0x96   : > { %v1074_v28 = vpop.eup %1073  ;;  %v489_v29 = vmul.f32 0.6931472, %v1072_v26 }
  0x97   : > { %v491_v30 = vmul.f32 0.6931472, %v1074_v28  ;;  %v1078_v57 = vpop.eup (!%p913_p1), %1077 }
  0x98   : > { %v492_v31 = vadd.f32 %v489_v29, %v476_v25  ;;  %v1080_v58 = vpop.eup (!%p913_p1), %1079  ;;  %v634_v59 = vmul.f32 (!%p913_p1), 0.6931472, %v1078_v57 }
  0x99   : > { %v493_v32 = vadd.f32 %v491_v30, %v477_v27  ;;  %v1082_v60 = vpop.eup (!%p913_p1), %1081  ;;  %v636_v61 = vmul.f32 (!%p913_p1), 0.6931472, %v1080_v58 }
  0x9a   : > { %v494_v33 = vmin.f32 %v492_v31, 100.0  ;;  %v1084_v62 = vpop.eup (!%p913_p1), %1083  ;;  %v642_v63 = vmul.f32 (!%p913_p1), 0.6931472, %v1082_v60  ;;  %v637_v0 = vmax.f32 (!%p913_p1), %v634_v59, -100.0 }
  0x9b   : > { %v495_v35 = vmin.f32 %v493_v32, 100.0  ;;  %v644_v1 = vmul.f32 (!%p913_p1), 0.6931472, %v1084_v62  ;;  %v638_v3 = vmax.f32 (!%p913_p1), %v636_v61, -100.0 }
  0x9c   : > { %v496_v36 = vsub.f32 0.0, %v494_v33  ;;  %v645_v2 = vmax.f32 (!%p913_p1), %v642_v63, -100.0 }
  0x9d   : > { %v497_v37 = vsub.f32 0.0, %v495_v35  ;;  %v646_v4 = vmax.f32 (!%p913_p1), %v644_v1, -100.0 }
  0x9e   : > { %v522_v38 = vmul.f32 %v903_v34, %v496_v36  ;;  %670 = vperm.xlu1 (!%p913_p1), %1075, %v645_v2   ;;  %v648_v5 = vsub.f32 (!%p913_p1), %v637_v0, %v645_v2 }
  0x9f   : > { %v523_v39 = vmul.f32 %v903_v34, %v497_v37  ;;  %v649_v6 = vsub.f32 (!%p913_p1), %v638_v3, %v646_v4 }
  0xa0   : > { %524 = vadd.xlane.f32.xlu0 %v522_v38 }
  0xa2   : > { %675 = vperm.xlu1 (!%p913_p1), %1075, %v646_v4  }
  0xa4   : > { %526 = vadd.xlane.f32.xlu0 %v523_v39 }
  0xba   : > { %658 = vperm.xlu0 (!%p913_p1), %1076, %v648_v5  }
  0xbe   : > { %663 = vperm.xlu0 (!%p913_p1), %1076, %v649_v6  }
  0xc2   : > { %693 = vperm.xlu0 (!%p913_p1), %1076, %v915_v7  }
 0x11d   : > { %v671_v9 = vpop.permute.xlu1 (!%p913_p1), %670 }
 0x121   : > { %v676_v19 = vpop.permute.xlu1 (!%p913_p1), %675 }
 0x12d   : > { %v525_v40 = vpop.xlane.xlu0 %524 }
 0x131   : > { %v527_v43 = vpop.xlane.xlu0 %526 }
 0x139   : > { %v659_v10 = vpop.permute.xlu0 (!%p913_p1), %658 }
 0x13a   : > { %v666_v11 = vmul.f32 (!%p913_p1), %v914_v8, %v659_v10 }
 0x13c   : > { %v678_v15 = vadd.f32 (!%p913_p1), %v671_v9, %v666_v11 }
 0x13d   : > { %v664_v14 = vpop.permute.xlu0 (!%p913_p1), %663 }
 0x13e   : > { %v667_v16 = vmul.f32 (!%p913_p1), %v914_v8, %v664_v14  ;;  %v680_v22 = vsub.f32 (!%p913_p1), 0.0, %v678_v15 }
 0x140   : > { %v679_v20 = vadd.f32 (!%p913_p1), %v676_v19, %v667_v16 }
 0x141   : > { %v694_v21 = vpop.permute.xlu0 (!%p913_p1), %693 }
 0x142   : > { %v681_v23 = vsub.f32 (!%p913_p1), 0.0, %v679_v20 }
 0x168   : > { %v616_v42 = vpop.f32.mrb[0].mxu0 }
 0x169   : > { %v617_v44 = vadd.f32 %v616_v42, %v525_v40  ;;  %v950_v45 = vpop.f32.mrb[1].mxu0  ;;  %630 = sbr.rel (%p913_p1) target bundleno = 382 (0x17e), region = 97 }
 0x16a   : > { %v619_v46 = vpop.f32.mrb[2].mxu0 }
 0x16b   : > { %v623_v48 = vadd.f32 %v617_v44, %v498_v41  ;;  %v620_v49 = vadd.f32 %v619_v46, %v527_v43  ;;  %v951_v50 = vpop.f32.mrb[3].mxu0 }
 0x16d   : > { %625 = vst [vmem:[%s1464_s24] sm:$0xff] %v623_v48  ;;  %v624_v51 = vadd.f32 %v620_v49, %v499_v47 }
 0x16f   : > { %626 = vst [vmem:[%s1464_s24 + $0x8] sm:$0xff] %v624_v51 }
 0x174   : > { %v682_v12 = vld [vmem:[%s1464_s24] sm:$0xff] }
 0x175   : > { %v684_v17 = vsub.f32 0.0, %v682_v12 }
 0x176   : > { %v683_v13 = vld [vmem:[%s1464_s24 + $0x8] sm:$0xff] }
 0x177   : > { %v685_v18 = vsub.f32 0.0, %v683_v13  ;;  %v696_v24 = vmul.f32 %v694_v21, %v684_v17 }
 0x179   : > { %v697_v25 = vmul.f32 %v694_v21, %v685_v18  ;;  %v698_v26 = vadd.f32 %v696_v24, %v680_v22 }
 0x17b   : > { %v699_v27 = vadd.f32 %v697_v25, %v681_v23  ;;  %700 = vst [vmem:[%s1464_s24] sm:$0xff] %v698_v26 }
 0x17d   : > { %701 = vst [vmem:[%s1464_s24 + $0x8] sm:$0xff] %v699_v27 }
 0x17e PF: > { %s922_s0 = sshll.u32 %s1223_s28, 8  ;;  %s1611_s15 = sld [smem:[#allocation20_spill]] }
 0x17f   : > { %s718_s20 = sshll.u32 %s1464_s24, 4  ;;  %s1612_s12 = sand.u32 1, %s1199_s22   ;;  %s1511_s20 = int_to_ptr.vmem [resolvable:$true] %s718_s20 }
 0x180   : > { %s1515_s17 = scalar_lea.sflag [#allocation5], %s1612_s12  ;;  %s1113_s11 = scalar_lea.vmem %s1511_s20, 256 }
 0x181   : > { %p1114_p13 = scmp.ne.s32.totalorder %s1511_s20, %s1113_s11  ;;  %p1613_p0 = scmp.ne.s32.totalorder %s1604_s19, 0 }
 0x182   : > { %s1244_s28 = smov [#allocation6]  }
 0x183   : > { %p1115_p2 = pnand %p1114_p13, %p1613_p0  ;;  %s1117_s18 = sshll.u32 %s1244_s28, 4  ;;  %s1118_s18 = int_to_ptr.vmem [resolvable:$false] %s1117_s18 }
 0x184   : > { %s1508_s16 = scalar_lea.hbm %s1611_s15, %s922_s0  ;;  %s1119_s23 = scalar_lea.vmem %s1118_s18, 512 }
 0x185   : > { %p1116_p4 = pneg %p1115_p2  ;;  %p1120_p5 = scmp.lt.s32.totalorder %s1511_s20, %s1118_s18 }
 0x186   : > { %p1121_p8 = scmp.lt.s32.totalorder %s1119_s23, %s1113_s11 }
 0x188   : > { %p1122_p9 = por %p1121_p8, %p1120_p5 }
 0x18a   : > { %p1123_p6 = pnand %p1122_p9, %p1116_p4 }
 0x18c   : > { %1126 = shalt.err (!%p1123_p6)
}
 0x18d   : > { %s1127_s10 = scalar_lea.hbm %s1508_s16, 256  ;;  %s1131_s24 = scalar_lea.hbm %s1611_s15, 512 }
 0x18e   : > { %p1128_p10 = scmp.ne.s32.totalorder %s1508_s16, %s1127_s10  ;;  %p1132_p12 = scmp.lt.u32.totalorder %s1508_s16, %s1611_s15 }
 0x18f   : > { %p1133_p7 = scmp.lt.u32.totalorder %s1131_s24, %s1127_s10  ;;  %p1135_p13 = scmp.lt.u32.totalorder %s1127_s10, %s1508_s16 }
 0x190   : > { %p1129_p11 = pnand %p1128_p10, %p1613_p0 }
 0x191   : > { %p1134_p1 = por %p1133_p7, %p1132_p12 }
 0x192   : > { %p1130_p3 = pneg %p1129_p11 }
 0x193   : > { %p1136_p2 = por %p1135_p13, %p1134_p1 }
 0x195   : > { %p1137_p4 = pnand %p1136_p2, %p1130_p3 }
 0x197   : > { %1140 = shalt.err (!%p1137_p4)
}
 0x198   : > { %s1245_s27 = smov 128   ;;  %s1246_s8 = smov 8  }
 0x199   : > { %954 = dma.vmem_to_hbm [thread:$0]  (%p1613_p0), %s1511_s20, 256, %s1508_s16, %s1515_s17, %s1245_s27, %s1245_s27, %s1246_s8  }
 0x19a PF: > { %s1614_s6 = sld [smem:[#allocation9_spill]]  ;;  %s1615_s21 = sld [smem:[#allocation17_spill]] }
 0x19b   : > { %p960_p5 = scmp.ge.s32.totalorder %s1235_s7, 2 }
 0x1a0   : > { %s733_s0 = sand.u32 1, %s1614_s6   ;;  %p1616_p8 = scmp.ne.s32.totalorder %s1615_s21, 0 }
 0x1a1   : > { %s734_s29 = scalar_lea.sflag [#allocation5], %s733_s0 }
 0x1a2   : > { %p957_p9 = pnand %p960_p5, %p1616_p8 }
 0x1a4   : > { %1190 = dma.done.wait (!%p957_p9), %s734_s29, 256  }
 0x1a5   : > { %1192 = vsyncadd (!%p957_p9), %s734_s29, 4294967040  ;;  %s22_s7 = sadd.s32 1, %s1235_s7   ;;  %s1617_s14 = sld [smem:[#allocation10_spill]] }
 0x1a6   : > { %p19_p6 = scmp.ge.s32.totalorder %s22_s7, 6   ;;  %s1618_s23 = sld [smem:[#allocation15_spill]] }
 0x1a7   : > { %s1619_s19 = sld [smem:[#allocation16_spill]]  ;;  %s1620_s27 = sld [smem:[#allocation11_spill]] }
 0x1a8   : > { %s1621_s28 = sld [smem:[#allocation12_spill]]  ;;  %s1622_s29 = sld [smem:[#allocation13_spill]] }
 0x1a9   : > { %s1623_s30 = sld [smem:[#allocation14_spill]]  ;;  %s1624_s21 = smov %s1199_s22 }
 0x1aa   : > { %s1626_s24 = smov %s1211_s25  ;;  %s1627_s25 = smov %s1215_s26 }
 0x1ab   : > { %s1625_s22 = smov %s1617_s14  ;;  %21 = sbr.rel (!%p19_p6) target bundleno = 13 (0xd), region = 158 }
 0x1ad   : > { %s1628_s26 = smov %s1619_s19 }
 0x1b2   :  { %739 = vsyncpa [#allocation4], 1 }
 0x1b3   :  { %741 = vsyncpa [#allocation4 + $0x1], 1 }
 0x1b4   :  { %742 = vsyncpa [#allocation5], 1 }
 0x1b5   :  { %744 = vsyncpa [#allocation5 + $0x1], 1 }

</bundles_post_ra>
